<compile_context>
chip_gen: v6e
topology: v6e:2x2x1
jax: 0.10.0
libtpu: 0.0.40
codegen_flags: <defaults>
</compile_context>

<pallas_src>
import functools

import jax
import jax.numpy as jnp
from jax.experimental import pallas as pl
from jax.experimental.pallas import tpu as pltpu


def _round_up(x, m):
    return (x + m - 1) // m * m


def irisnet_kernel(x_ref, w1_ref, b1_ref, w2_ref, b2_ref, w3_ref, b3_ref, o_ref):
    """Fused fc1 -> ReLU -> fc2 -> ReLU -> fc3 on one (TB, 4) batch tile.

    All intermediates live in vregs/VMEM only.  MXU accumulation is f32; the
    astype() to the weight dtype is a no-op on the f32 operand path and enables
    bf16 MXU operands on the bf16 path.
    """
    x = x_ref[...].astype(w1_ref.dtype)                                  # (TB, 4)
    h1 = jnp.dot(x, w1_ref[...], preferred_element_type=jnp.float32)
    h1 = jnp.maximum(h1 + b1_ref[...], 0.0)                              # (TB, H1) f32
    h2 = jnp.dot(h1.astype(w2_ref.dtype), w2_ref[...],
                 preferred_element_type=jnp.float32)
    h2 = jnp.maximum(h2 + b2_ref[...], 0.0)                              # (TB, H2) f32
    out = jnp.dot(h2.astype(w3_ref.dtype), w3_ref[...],
                  preferred_element_type=jnp.float32) + b3_ref[...]      # (TB, C)
    o_ref[...] = out.astype(o_ref.dtype)                                 # narrow store


def init_params(key, input_size, hidden1_size, hidden2_size, num_classes):
    """PyTorch nn.Linear-style init: U(-1/sqrt(fan_in), 1/sqrt(fan_in)).

    Weights are stored transposed as (in_features, out_features) so the kernel
    computes y = x @ W + b directly.
    """
    ks = jax.random.split(key, 6)

    def linear(kw, kb, fan_in, fan_out):
        bound = 1.0 / jnp.sqrt(fan_in)
        w = jax.random.uniform(kw, (fan_in, fan_out), jnp.float32, -bound, bound)
        b = jax.random.uniform(kb, (1, fan_out), jnp.float32, -bound, bound)
        return w, b

    w1, b1 = linear(ks[0], ks[1], input_size, hidden1_size)
    w2, b2 = linear(ks[2], ks[3], hidden1_size, hidden2_size)
    w3, b3 = linear(ks[4], ks[5], hidden2_size, num_classes)
    return {"w1": w1, "b1": b1, "w2": w2, "b2": b2, "w3": w3, "b3": b3}


def prepare_params(params, compute_dtype=jnp.float32):
    """Cast weights to the MXU operand dtype (bf16 on v6e/v7x if desired).

    Biases stay f32 (added to the f32 accumulator).  No padding: the weights
    are tiny and stay VMEM-resident as full-array blocks.  On v5e prefer
    compute_dtype=jnp.float32 (its VPU has no bf16).
    """
    return {k: v.astype(compute_dtype if k.startswith("w") else jnp.float32)
            for k, v in params.items()}


def _pick_batch_tile(B, block_batch, sublane):
    """Large batch tile (amortizes ~0.35 us/step pipeline overhead), rounded to
    the dtype's sublane (and 128 rows when large).  If the whole batch fits in
    one step, halve the tile so the parallel grid has >= 2 steps (v7x 2-TC)."""
    TB = _round_up(max(min(block_batch, B), 1), sublane)
    if TB >= 256:
        TB = _round_up(TB, 128)
    if _round_up(B, TB) <= TB and TB >= 2 * sublane:
        TB = _round_up((TB + 1) // 2, sublane)
    return TB


@functools.partial(jax.jit, static_argnames=("block_batch",))
def irisnet_forward(x, pparams, block_batch=4096):
    """x: (B, input_size) f32.  pparams: params from prepare_params."""
    w1, b1 = pparams["w1"], pparams["b1"]
    w2, b2 = pparams["w2"], pparams["b2"]
    w3, b3 = pparams["w3"], pparams["b3"]

    B, F = x.shape
    C = w3.shape[1]

    # Native sublane of the MXU operand dtype: 8 rows for f32, 16 for bf16.
    sublane = 8 * (4 // jnp.dtype(w1.dtype).itemsize)
    TB = _pick_batch_tile(B, block_batch, sublane)
    Bp = _round_up(B, TB)

    # Only the batch dim is ever padded (and only when B % TB != 0); the feature
    # (4) and class (3) dims go to/from HBM unpadded.
    xp = x if Bp == B else jnp.pad(x, ((0, Bp - B), (0, 0)))

    # Constant index_map -> fetched once, VMEM-resident across the batch grid.
    resident = lambda arr: pl.BlockSpec(arr.shape, lambda i: (0, 0))

    out = pl.pallas_call(
        irisnet_kernel,
        out_shape=jax.ShapeDtypeStruct((Bp, C), jnp.float32),
        grid=(Bp // TB,),
        in_specs=[
            pl.BlockSpec((TB, F), lambda i: (i, 0)),        # x: tiled over batch only
            resident(w1), resident(b1),
            resident(w2), resident(b2),
            resident(w3), resident(b3),
        ],
        out_specs=pl.BlockSpec((TB, C), lambda i: (i, 0)),  # narrow (TB, 3) logits
        compiler_params=pltpu.CompilerParams(
            # Batch rows are independent -> shard the grid across v7x's two
            # TensorCores; harmless on v5e/v6e.
            dimension_semantics=("parallel",),
        ),
    )(xp, w1, b1, w2, b2, w3, b3)

    return out if Bp == B else out[:B]


def irisnet_ref(x, params):
    h1 = jnp.maximum(x @ params["w1"] + params["b1"], 0.0)
    h2 = jnp.maximum(h1 @ params["w2"] + params["b2"], 0.0)
    return h2 @ params["w3"] + params["b3"]


if __name__ == "__main__":
    # Iris config: 4 input features, two hidden layers of 32, 3 classes.
    input_size, hidden1_size, hidden2_size, num_classes = 4, 32, 32, 3
    batch = 8

    key = jax.random.PRNGKey(0)
    kx, kp, kx2 = jax.random.split(key, 3)
    x = jax.random.normal(kx, (batch, input_size), jnp.float32)
    params = init_params(kp, input_size, hidden1_size, hidden2_size, num_classes)
    ref = irisnet_ref(x, params)

    # --- f32 operand path (tight tolerance) --------------------------------
    pparams_f32 = prepare_params(params, jnp.float32)
    out = jax.block_until_ready(irisnet_forward(x, pparams_f32))
    assert out.shape == (batch, num_classes)
    assert jnp.allclose(out, ref, atol=1e-5, rtol=1e-5)

    # --- larger, non-tile-multiple batch exercises the pipelined batch grid -
    x_big = jax.random.normal(kx2, (1000, input_size), jnp.float32)
    out_big = jax.block_until_ready(irisnet_forward(x_big, pparams_f32))
    assert out_big.shape == (1000, num_classes)
    assert jnp.allclose(out_big, irisnet_ref(x_big, params), atol=1e-5, rtol=1e-5)

    # --- bf16 operand path (v6e/v7x MXU-friendly), f32 accumulation ---------
    pparams_bf16 = prepare_params(params, jnp.bfloat16)
    out_bf16 = jax.block_until_ready(irisnet_forward(x, pparams_bf16))
    assert out_bf16.shape == (batch, num_classes)
    assert jnp.allclose(out_bf16, ref, atol=5e-2, rtol=5e-2)

    print("KERNEL_OK")
</pallas_src>

<mosaic_0001>
module attributes {stable_mosaic.version = 11 : i64} {
  func.func @irisnet_kernel(%arg0: i32, %arg1: memref<8x4xf32, #tpu.memory_space<vmem>>, %arg2: memref<4x32xf32, #tpu.memory_space<vmem>>, %arg3: memref<1x32xf32, #tpu.memory_space<vmem>>, %arg4: memref<32x32xf32, #tpu.memory_space<vmem>>, %arg5: memref<1x32xf32, #tpu.memory_space<vmem>>, %arg6: memref<32x3xf32, #tpu.memory_space<vmem>>, %arg7: memref<1x3xf32, #tpu.memory_space<vmem>>, %arg8: memref<8x3xf32, #tpu.memory_space<vmem>>) attributes {dimension_semantics = [#tpu.dimension_semantics<parallel>], iteration_bounds = array<i64: 1>, scalar_prefetch = 0 : i64, scratch_operands = 0 : i64, tpu.core_type = #tpu.core_type<tc>, window_params = [{transform_indices = @transform_0, window_bounds = array<i64: 8, 4>}, {pipeline_mode = #tpu.pipeline_mode<synchronous>, transform_indices = @transform_1, window_bounds = array<i64: 4, 32>}, {pipeline_mode = #tpu.pipeline_mode<synchronous>, transform_indices = @transform_2, window_bounds = array<i64: 1, 32>}, {pipeline_mode = #tpu.pipeline_mode<synchronous>, transform_indices = @transform_3, window_bounds = array<i64: 32, 32>}, {pipeline_mode = #tpu.pipeline_mode<synchronous>, transform_indices = @transform_4, window_bounds = array<i64: 1, 32>}, {pipeline_mode = #tpu.pipeline_mode<synchronous>, transform_indices = @transform_5, window_bounds = array<i64: 32, 3>}, {pipeline_mode = #tpu.pipeline_mode<synchronous>, transform_indices = @transform_6, window_bounds = array<i64: 1, 3>}, {transform_indices = @transform_7, window_bounds = array<i64: 8, 3>}]} {
    %c0 = arith.constant 0 : index
    %c0_0 = arith.constant 0 : index
    %0 = vector.load %arg1[%c0, %c0_0] : memref<8x4xf32, #tpu.memory_space<vmem>>, vector<8x4xf32>
    %c0_1 = arith.constant 0 : index
    %c0_2 = arith.constant 0 : index
    %1 = vector.load %arg2[%c0_1, %c0_2] : memref<4x32xf32, #tpu.memory_space<vmem>>, vector<4x32xf32>
    %cst = arith.constant dense<0.000000e+00> : vector<8x32xf32>
    %2 = tpu.matmul %0, %1, %cst {dimension_numbers = #tpu.dot_dimension_numbers<[1], [0], [0], [1], [0, 0, 1, 1], [], []>} : vector<8x4xf32>, vector<4x32xf32>, vector<8x32xf32> -> vector<8x32xf32>
    %c0_3 = arith.constant 0 : index
    %c0_4 = arith.constant 0 : index
    %3 = vector.load %arg3[%c0_3, %c0_4] : memref<1x32xf32, #tpu.memory_space<vmem>>, vector<1x32xf32>
    %4 = vector.broadcast %3 : vector<1x32xf32> to vector<8x32xf32>
    %5 = arith.addf %2, %4 : vector<8x32xf32>
    %cst_5 = arith.constant 0.000000e+00 : f32
    %6 = vector.broadcast %cst_5 : f32 to vector<8x32xf32>
    %7 = arith.maximumf %5, %6 : vector<8x32xf32>
    %c0_6 = arith.constant 0 : index
    %c0_7 = arith.constant 0 : index
    %8 = vector.load %arg4[%c0_6, %c0_7] : memref<32x32xf32, #tpu.memory_space<vmem>>, vector<32x32xf32>
    %cst_8 = arith.constant dense<0.000000e+00> : vector<8x32xf32>
    %9 = tpu.matmul %7, %8, %cst_8 {dimension_numbers = #tpu.dot_dimension_numbers<[1], [0], [0], [1], [0, 0, 1, 1], [], []>} : vector<8x32xf32>, vector<32x32xf32>, vector<8x32xf32> -> vector<8x32xf32>
    %c0_9 = arith.constant 0 : index
    %c0_10 = arith.constant 0 : index
    %10 = vector.load %arg5[%c0_9, %c0_10] : memref<1x32xf32, #tpu.memory_space<vmem>>, vector<1x32xf32>
    %11 = vector.broadcast %10 : vector<1x32xf32> to vector<8x32xf32>
    %12 = arith.addf %9, %11 : vector<8x32xf32>
    %cst_11 = arith.constant 0.000000e+00 : f32
    %13 = vector.broadcast %cst_11 : f32 to vector<8x32xf32>
    %14 = arith.maximumf %12, %13 : vector<8x32xf32>
    %c0_12 = arith.constant 0 : index
    %c0_13 = arith.constant 0 : index
    %15 = vector.load %arg6[%c0_12, %c0_13] : memref<32x3xf32, #tpu.memory_space<vmem>>, vector<32x3xf32>
    %cst_14 = arith.constant dense<0.000000e+00> : vector<8x3xf32>
    %16 = tpu.matmul %14, %15, %cst_14 {dimension_numbers = #tpu.dot_dimension_numbers<[1], [0], [0], [1], [0, 0, 1, 1], [], []>} : vector<8x32xf32>, vector<32x3xf32>, vector<8x3xf32> -> vector<8x3xf32>
    %c0_15 = arith.constant 0 : index
    %c0_16 = arith.constant 0 : index
    %17 = vector.load %arg7[%c0_15, %c0_16] : memref<1x3xf32, #tpu.memory_space<vmem>>, vector<1x3xf32>
    %18 = vector.broadcast %17 : vector<1x3xf32> to vector<8x3xf32>
    %19 = arith.addf %16, %18 : vector<8x3xf32>
    %c0_17 = arith.constant 0 : index
    %c0_18 = arith.constant 0 : index
    %20 = vector.load %arg8[%c0_17, %c0_18] : memref<8x3xf32, #tpu.memory_space<vmem>>, vector<8x3xf32>
    tpu.vector_store %arg8[%c0_17, %c0_18], %19 {strides = array<i32>} : memref<8x3xf32, #tpu.memory_space<vmem>>, vector<8x3xf32>,
    return
  }
  func.func @transform_0(%arg0: i32) -> (i32, i32) {
    %c0_i32 = arith.constant 0 : i32
    %c0_i32_0 = arith.constant 0 : i32
    return %arg0, %c0_i32 : i32, i32
  }
  func.func @transform_1(%arg0: i32) -> (i32, i32) {
    %c0_i32 = arith.constant 0 : i32
    %c0_i32_0 = arith.constant 0 : i32
    %c0_i32_1 = arith.constant 0 : i32
    return %c0_i32, %c0_i32_0 : i32, i32
  }
  func.func @transform_2(%arg0: i32) -> (i32, i32) {
    %c0_i32 = arith.constant 0 : i32
    %c0_i32_0 = arith.constant 0 : i32
    %c0_i32_1 = arith.constant 0 : i32
    return %c0_i32, %c0_i32_0 : i32, i32
  }
  func.func @transform_3(%arg0: i32) -> (i32, i32) {
    %c0_i32 = arith.constant 0 : i32
    %c0_i32_0 = arith.constant 0 : i32
    %c0_i32_1 = arith.constant 0 : i32
    return %c0_i32, %c0_i32_0 : i32, i32
  }
  func.func @transform_4(%arg0: i32) -> (i32, i32) {
    %c0_i32 = arith.constant 0 : i32
    %c0_i32_0 = arith.constant 0 : i32
    %c0_i32_1 = arith.constant 0 : i32
    return %c0_i32, %c0_i32_0 : i32, i32
  }
  func.func @transform_5(%arg0: i32) -> (i32, i32) {
    %c0_i32 = arith.constant 0 : i32
    %c0_i32_0 = arith.constant 0 : i32
    %c0_i32_1 = arith.constant 0 : i32
    return %c0_i32, %c0_i32_0 : i32, i32
  }
  func.func @transform_6(%arg0: i32) -> (i32, i32) {
    %c0_i32 = arith.constant 0 : i32
    %c0_i32_0 = arith.constant 0 : i32
    %c0_i32_1 = arith.constant 0 : i32
    return %c0_i32, %c0_i32_0 : i32, i32
  }
  func.func @transform_7(%arg0: i32) -> (i32, i32) {
    %c0_i32 = arith.constant 0 : i32
    %c0_i32_0 = arith.constant 0 : i32
    return %arg0, %c0_i32 : i32, i32
  }
}

</mosaic_0001>

<bundles_post_ra>
// kernel: irisnet_forward.1
= control target key start
LH: loop header
LB: loop body
LE: loop exit
PB: predicated region body
PF: predicated region fallthrough
CT: control target
= control target key end

     0   :  { %vm39_vm0 = vcmask 1043456   ;;  %vm35_vm1 = vcmask 31744   ;;  %v338_v0 = vmov 0.0   ;;  %vm339_vm2 = vmmov 0   ;;  %s424_s1 = inlined_call_operand.vmem [shape: f32[4,32], index: 1, kind: input, shape index: {}]   ;;  %s425_s0 = inlined_call_operand.vmem [shape: f32[8,4], index: 0, kind: input, shape index: {}]   ;;  %s426_s3 = inlined_call_operand.vmem [shape: f32[32,32], index: 3, kind: input, shape index: {}]   ;;  %s427_s5 = inlined_call_operand.vmem [shape: f32[32,3], index: 5, kind: input, shape index: {}]   ;;  %s428_s2 = inlined_call_operand.vmem [shape: f32[1,32], index: 2, kind: input, shape index: {}]   ;;  %s429_s4 = inlined_call_operand.vmem [shape: f32[1,32], index: 4, kind: input, shape index: {}]   ;;  %s430_s6 = inlined_call_operand.vmem [shape: f32[1,3], index: 6, kind: input, shape index: {}]   ;;  %s431_s7 = inlined_call_operand.vmem [shape: f32[8,3], index: 7, kind: output, shape index: {}]  }
   0x1   :  { %309 = vmatprep.subr.mxu0 %v338_v0  ;;  %v27_v1 = vld [vmem:[%s424_s1] sm:$0xf]  ;;  %311 = vmatprep.mubr.msk.f32.mxu0 %vm339_vm2, %v338_v0  ;;  %v117_v3 = vld [vmem:[%s426_s3 + $0x18] sm:$0xff]  ;;  %v116_v4 = vld [vmem:[%s426_s3 + $0x10] sm:$0xff]  ;;  %vm125_vm3 = vcmask 261120   ;;  %vm284_vm4 = vcmask 23552  }
   0x2   :  { %v26_v2 = vld [vmem:[%s425_s0] sm:$0xff]  ;;  %310 = vmatpush3.msk.msra.mxu0 %vm39_vm0, %v27_v1  ;;  %314 = vmatprep.subr.mxu1 %v338_v0  ;;  %v115_v5 = vld [vmem:[%s426_s3 + $0x8] sm:$0xff]  ;;  %v203_v7 = vld [vmem:[%s427_s5 + $0x18] sm:$0xff] }
   0x3   :  { %312 = vmatmul.mubr.msk.f32.vlgmr.msra.gmra.mxu0 %vm35_vm1, %v26_v2  ;;  %315 = vmatpush3.msra.mxu1 %v117_v3  ;;  %v114_v6 = vld [vmem:[%s426_s3] sm:$0xff]  ;;  %v202_v13 = vld [vmem:[%s427_s5 + $0x10] sm:$0xff]  ;;  %v201_v14 = vld [vmem:[%s427_s5 + $0x8] sm:$0xff] }
   0x4   :  { %316 = vmatprep.subr.mxu1 %v338_v0  ;;  %322 = vmatprep.mubr.msk.f32.mxu1 %vm339_vm2, %v338_v0  ;;  %v290_v8 = vld [vmem:[%s428_s2] ss:$0 sm:$0xff] }
   0x5   :  { %325 = vmatprep.subr.mxu0 %v338_v0  ;;  %333 = vmatprep.mubr.msk.f32.mxu0 %vm339_vm2, %v338_v0  ;;  %v200_v15 = vld [vmem:[%s427_s5] sm:$0xff] }
   0x6   :  { %317 = vmatpush3.msra.mxu1 %v116_v4  ;;  %326 = vmatpush3.msra.mxu0 %v203_v7  ;;  %v293_v16 = vld [vmem:[%s429_s4] ss:$0 sm:$0xff] }
   0x7   :  { %318 = vmatprep.subr.mxu1 %v338_v0  ;;  %327 = vmatprep.subr.mxu0 %v338_v0  ;;  %v295_v21 = vld [vmem:[%s430_s6] ss:$0 sm:$0xff] }
   0x8   :  { %319 = vmatpush3.msra.mxu1 %v115_v5  ;;  %328 = vmatpush3.msra.mxu0 %v202_v13 }
   0x9   :  { %320 = vmatprep.subr.mxu1 %v338_v0  ;;  %329 = vmatprep.subr.mxu0 %v338_v0 }
   0xa   :  { %321 = vmatpush3.msra.mxu1 %v114_v6  ;;  %330 = vmatpush3.msra.mxu0 %v201_v14 }
   0xb   :  { %331 = vmatprep.subr.mxu0 %v338_v0 }
   0xc   :  { %332 = vmatpush3.msra.mxu0 %v200_v15 }
  0xc3   :  { %v109_v9 = vpop.f32.mrf.mxu0 }
  0xc4   :  { %v110_v10 = vadd.f32 %v290_v8, %v109_v9 }
  0xc5   :  { %v313_v11 = vpop.f32.mrf.mxu0 }
  0xc6   :  { %v113_v12 = vmax.f32 %v110_v10, 0.0 }
  0xc8   :  { %323 = vmatmul.mubr.msk.f32.vlgmr.msra.gmra.mxu1 %vm125_vm3, %v113_v12 }
 0x188   :  { %v195_v17 = vpop.f32.mrf.mxu1 }
 0x189   :  { %v196_v18 = vadd.f32 %v293_v16, %v195_v17 }
 0x18a   :  { %v324_v19 = vpop.f32.mrf.mxu1 }
 0x18b   :  { %v199_v20 = vmax.f32 %v196_v18, 0.0 }
 0x18d   :  { %334 = vmatmul.mubr.msk.f32.vlgmr.msra.gmra.mxu0 %vm125_vm3, %v199_v20 }
 0x24d   :  { %v280_v22 = vpop.f32.mrf.mxu0 }
 0x24e   :  { %v281_v23 = vadd.f32 %v295_v21, %v280_v22 }
 0x24f   :  { %v335_v24 = vpop.f32.mrf.mxu0 }
 0x250   :  { %285 = vst.msk [vmem:[%s431_s7] sm:$0xff] %vm284_vm4, %v281_v23 }

</bundles_post_ra>
